<compile_context>
chip_gen: v6e
topology: v6e:2x2x1
jax: 0.10.0
libtpu: 0.0.40
codegen_flags: <defaults>
</compile_context>

<pallas_src>
import jax
import jax.numpy as jnp
from jax.experimental import pallas as pl
from jax.experimental.pallas import tpu as pltpu


def _cdiv(a, b):
    return -(-a // b)


def _lambda_silu_kernel(x_ref, o_ref):
    x = x_ref[...]
    if jnp.dtype(x_ref.dtype).itemsize < 4:
        # Narrow dtypes (bf16 / fp8 / int8): keep the divide on the EUP
        # (approx reciprocal) so the VPU never becomes the binding unit on
        # v7x; f32 intermediate, cast back on store.
        xf = x.astype(jnp.float32)
        o_ref[...] = (xf * pl.reciprocal(1.0 + jnp.exp(-xf), approx=True)
                      ).astype(o_ref.dtype)
    else:
        # f32: exact sigmoid (HBM-bound at 8 bytes/elem on every generation).
        o_ref[...] = x * jax.nn.sigmoid(x)


_LANE_CANDIDATES = (8192, 4096, 2048, 1024, 512, 256, 128)
_TARGET_BLOCK_BYTES = 4 << 20   # ~4 MiB blocks
_MIN_SPLIT_BYTES = 256 << 10    # >= this: keep >= 2 parallel blocks (v7x 2 TCs)
_VMEM_LIMIT_BYTES = 32 << 20    # 2 bufs x (in+out) x 4 MiB = 16 MiB + headroom
_SUBLANE = {4: 8, 2: 16, 1: 32}  # packed sublane count per itemsize


def _silu_ref(x):
    return x * jax.nn.sigmoid(x)


def _silu_2d(x2d, tile_rows, donate):
    rows, lane_w = x2d.shape
    grid = (_cdiv(rows, tile_rows),)
    return pl.pallas_call(
        _lambda_silu_kernel,
        out_shape=jax.ShapeDtypeStruct(x2d.shape, x2d.dtype),
        grid_spec=pltpu.PrefetchScalarGridSpec(
            num_scalar_prefetch=0,
            grid=grid,
            in_specs=[pl.BlockSpec((tile_rows, lane_w), lambda i: (i, 0))],
            out_specs=pl.BlockSpec((tile_rows, lane_w), lambda i: (i, 0)),
        ),
        compiler_params=pltpu.CompilerParams(
            dimension_semantics=("parallel",),
            vmem_limit_bytes=_VMEM_LIMIT_BYTES,
        ),
        input_output_aliases=({0: 0} if donate else {}),
    )(x2d)


def lambda_forward(x, *, donate=False):
    """Pallas implementation of Lambda(lambda x: x * sigmoid(x)).

    Works for any array shape (elementwise); returns same shape/dtype.
    Set donate=True only when the caller donates x (adds input/output
    aliasing so no second full-size HBM buffer is allocated).
    """
    orig_shape = x.shape
    dtype = jnp.dtype(x.dtype)
    total = int(x.size)
    itemsize = dtype.itemsize

    # Zero-size or unsupported-layout dtypes: plain JAX keeps exact semantics.
    if total == 0 or itemsize not in _SUBLANE:
        return _silu_ref(x)

    sublane = _SUBLANE[itemsize]

    # ---- lane-dense 2D view: (rows, lane_w), lane_w a multiple of 128 ----
    # Prefer the largest lane width that divides the element count exactly
    # (no pad, no tail) while keeping at least one sublane group of rows.
    lane_w = next(
        (c for c in _LANE_CANDIDATES if total % c == 0 and total // c >= sublane),
        None,
    )
    if lane_w is None:
        lane_w = next((c for c in _LANE_CANDIDATES if total % c == 0), None)
    if lane_w is None:
        lane_w = 512  # ragged total: only a < lane_w tail handled outside

    main = (total // lane_w) * lane_w
    if main == 0:
        return _silu_ref(x)          # tiny tensor: not worth a kernel launch
    rows = main // lane_w

    # ---- block rows: ~4 MiB blocks, sublane-aligned; keep >= 2 blocks for
    #      medium tensors (even count preferred) so the ("parallel",) axis
    #      shards across both v7x TensorCores. ----
    target_rows = max(
        sublane, (_TARGET_BLOCK_BYTES // (lane_w * itemsize)) // sublane * sublane
    )
    num_blocks = _cdiv(rows, target_rows)
    if num_blocks == 1:
        if rows >= 2 * sublane and main * itemsize >= _MIN_SPLIT_BYTES:
            num_blocks = 2
    elif num_blocks % 2 == 1:
        num_blocks += 1
    if num_blocks == 1:
        tile_rows = rows             # single full-extent block
    else:
        tile_rows = _cdiv(_cdiv(rows, num_blocks), sublane) * sublane

    flat = x.reshape(-1)
    main_out = _silu_2d(flat[:main].reshape(rows, lane_w), tile_rows, donate)
    main_out = main_out.reshape(main)

    if main == total:
        return main_out.reshape(orig_shape)

    # Ragged tail (< lane_w elements): trivial plain-JAX op — no full-tensor
    # pad / slice round trip through HBM.
    tail_out = _silu_ref(flat[main:])
    return jnp.concatenate([main_out, tail_out]).reshape(orig_shape)


if __name__ == "__main__":
    key = jax.random.PRNGKey(0)

    # Primary check: NCHW f32, exact (divisible) fast path.
    x = jax.random.normal(key, (2, 4, 16, 16), dtype=jnp.float32)
    out = jax.block_until_ready(lambda_forward(x))
    ref = x * jax.nn.sigmoid(x)
    assert out.shape == x.shape and out.dtype == x.dtype
    assert jnp.allclose(out, ref, atol=1e-6, rtol=1e-6)

    # Ragged-size f32 path (kernel on the aligned bulk + plain-JAX tail).
    xr = jax.random.normal(jax.random.PRNGKey(1), (7, 300), dtype=jnp.float32)
    outr = jax.block_until_ready(lambda_forward(xr))
    refr = xr * jax.nn.sigmoid(xr)
    assert outr.shape == xr.shape and jnp.allclose(outr, refr, atol=1e-6, rtol=1e-6)

    # bf16 path (EUP-friendly approx-reciprocal sigmoid).
    xb = jax.random.normal(jax.random.PRNGKey(2), (2, 4, 16, 16), dtype=jnp.bfloat16)
    outb = jax.block_until_ready(lambda_forward(xb))
    refb = (xb.astype(jnp.float32) * jax.nn.sigmoid(xb.astype(jnp.float32))
            ).astype(jnp.bfloat16)
    assert outb.shape == xb.shape and outb.dtype == xb.dtype
    assert jnp.allclose(outb.astype(jnp.float32), refb.astype(jnp.float32),
                        atol=5e-2, rtol=5e-2)

    print("KERNEL_OK")
</pallas_src>

<mosaic_0001>
module attributes {stable_mosaic.version = 11 : i64} {
  func.func @_lambda_silu_kernel(%arg0: i32, %arg1: memref<8x256xf32, #tpu.memory_space<vmem>>, %arg2: memref<8x256xf32, #tpu.memory_space<vmem>>) attributes {dimension_semantics = [#tpu.dimension_semantics<parallel>], iteration_bounds = array<i64: 1>, scalar_prefetch = 0 : i64, scratch_operands = 0 : i64, tpu.core_type = #tpu.core_type<tc>, window_params = [{transform_indices = @transform_0, window_bounds = array<i64: 8, 256>}, {transform_indices = @transform_1, window_bounds = array<i64: 8, 256>}]} {
    %c0 = arith.constant 0 : index
    %c0_0 = arith.constant 0 : index
    %0 = vector.load %arg1[%c0, %c0_0] : memref<8x256xf32, #tpu.memory_space<vmem>>, vector<8x256xf32>
    %1 = arith.negf %0 : vector<8x256xf32>
    %2 = math.exp %1 : vector<8x256xf32>
    %cst = arith.constant 1.000000e+00 : f32
    %3 = vector.broadcast %cst : f32 to vector<8x256xf32>
    %4 = arith.addf %3, %2 : vector<8x256xf32>
    %5 = arith.divf %3, %4 : vector<8x256xf32>
    %6 = arith.mulf %0, %5 : vector<8x256xf32>
    %c0_1 = arith.constant 0 : index
    %c0_2 = arith.constant 0 : index
    %7 = vector.load %arg2[%c0_1, %c0_2] : memref<8x256xf32, #tpu.memory_space<vmem>>, vector<8x256xf32>
    tpu.vector_store %arg2[%c0_1, %c0_2], %6 {strides = array<i32>} : memref<8x256xf32, #tpu.memory_space<vmem>>, vector<8x256xf32>,
    return
  }
  func.func @transform_0(%arg0: i32) -> (i32, i32) {
    %c0_i32 = arith.constant 0 : i32
    %c0_i32_0 = arith.constant 0 : i32
    return %arg0, %c0_i32 : i32, i32
  }
  func.func @transform_1(%arg0: i32) -> (i32, i32) {
    %c0_i32 = arith.constant 0 : i32
    %c0_i32_0 = arith.constant 0 : i32
    return %arg0, %c0_i32 : i32, i32
  }
}

</mosaic_0001>

<bundles_post_ra>
// kernel: tpu_custom_call.1
= control target key start
LH: loop header
LB: loop body
LE: loop exit
PB: predicated region body
PF: predicated region fallthrough
CT: control target
= control target key end

     0   :  { %6 = vsyncpa [#allocation3], 0  ;;  %s128_s0 = inlined_call_operand.hbm [shape: f32[8,256], index: 0, kind: input, shape index: {}]   ;;  %s129_s1 = inlined_call_operand.hbm [shape: f32[8,256], index: 1, kind: output, shape index: {}]  }
   0x1   :  { %7 = vsyncpa [#allocation4], 0  ;;  %s110_s6 = smov [#allocation2]  }
   0x2   :  { %s14_s7 = sshll.u32 %s110_s6, 4  ;;  %s15_s7 = int_to_ptr.vmem [resolvable:$true] %s14_s7 }
   0x3   :  { %s74_s8 = scalar_lea.vmem %s15_s7, 256  ;;  %p79_p1 = scmp.lt.s32.totalorder %s15_s7, %s15_s7 }
   0x4   :  { %p75_p0 = scmp.ne.s32.totalorder %s15_s7, %s74_s8  ;;  %p80_p2 = scmp.lt.s32.totalorder %s74_s8, %s74_s8 }
   0x6   :  { %p81_p3 = por %p80_p2, %p79_p1 }
   0x8   :  { %p82_p4 = pnand %p81_p3, %p75_p0 }
   0xa   :  { %85 = shalt.err (!%p82_p4)
}
   0xb   :  { %17 = dma.hbm_to_vmem [thread:$0]  %s128_s0, 256, %s15_s7, [#allocation3]  }
   0xc   :  { %106 = dma.done.wait [#allocation3], 256  }
   0xd   :  { %107 = vsyncadd [#allocation3], 4294967040  ;;  %v21_v0 = vld [vmem:[#allocation2] sm:$0xff]  ;;  %v22_v1 = vld [vmem:[#allocation2 + $0x8] sm:$0xff]  ;;  %s111_s11 = smov [#allocation5]  }
   0xe   :  { %v54_v2 = vmul.f32 -1.442695, %v21_v0  ;;  %v55_v3 = vmul.f32 -1.442695, %v22_v1  ;;  %s45_s12 = sshll.u32 %s111_s11, 4  ;;  %s46_s12 = int_to_ptr.vmem [resolvable:$true] %s45_s12 }
   0xf   :  { %s86_s0 = scalar_lea.vmem %s46_s12, 256  ;;  %p91_p6 = scmp.lt.s32.totalorder %s46_s12, %s46_s12 }
  0x10   :  { %58 = vpow2.f32 %v54_v2  ;;  %p87_p5 = scmp.ne.s32.totalorder %s46_s12, %s86_s0  ;;  %p92_p7 = scmp.lt.s32.totalorder %s86_s0, %s86_s0 }
  0x11   :  { %60 = vpow2.f32 %v55_v3 }
  0x12   :  { %p93_p8 = por %p92_p7, %p91_p6 }
  0x14   :  { %p94_p9 = pnand %p93_p8, %p87_p5 }
  0x1d   :  { %v59_v4 = vpop.eup %58 }
  0x1e   :  { %v61_v5 = vpop.eup %60  ;;  %v29_v6 = vadd.f32 1.0, %v59_v4 }
  0x1f   :  { %v30_v7 = vadd.f32 1.0, %v61_v5 }
  0x20   :  { %62 = vrcp.f32 %v29_v6 }
  0x21   :  { %64 = vrcp.f32 %v30_v7 }
  0x2d   :  { %v63_v8 = vpop.eup %62 }
  0x2e   :  { %v65_v9 = vpop.eup %64  ;;  %v35_v10 = vmul.f32 %v63_v8, %v21_v0 }
  0x2f   :  { %v36_v11 = vmul.f32 %v65_v9, %v22_v1 }
  0x30   :  { %37 = vst [vmem:[#allocation5] sm:$0xff] %v35_v10 }
  0x31   :  { %38 = vst [vmem:[#allocation5 + $0x8] sm:$0xff] %v36_v11 }
  0x32   :  { %97 = shalt.err (!%p94_p9)
}
  0x33   :  { %48 = dma.vmem_to_hbm [thread:$0]  %s46_s12, 256, %s129_s1, [#allocation4]  }
  0x34   :  { %108 = dma.done.wait [#allocation4], 256  }
  0x35   :  { %109 = vsyncadd [#allocation4], 4294967040 }
  0x36   :  { %52 = vsyncpa [#allocation3], 1 }
  0x37   :  { %53 = vsyncpa [#allocation4], 1 }

</bundles_post_ra>
